<compile_context>
chip_gen: v6e
topology: v6e:2x2x1
jax: 0.10.0
libtpu: 0.0.40
codegen_flags: <defaults>
</compile_context>

<pallas_src>
import math
import functools

import numpy as np
import jax
import jax.numpy as jnp
from jax.experimental import pallas as pl
from jax.experimental.pallas import tpu as pltpu


def _round_up(x, m):
    return ((x + m - 1) // m) * m


# ----------------------------------------------------------------------------
# Tiled linear kernels (M-block grid; K and N are small, kept whole per block)
# ----------------------------------------------------------------------------
def _linear_bias_kernel(x_ref, w_ref, b_ref, o_ref):
    o_ref[...] = (
        jnp.dot(x_ref[...], w_ref[...], preferred_element_type=jnp.float32)
        + b_ref[...]
    )


def _linear_nobias_kernel(x_ref, w_ref, o_ref):
    o_ref[...] = jnp.dot(x_ref[...], w_ref[...], preferred_element_type=jnp.float32)


def pallas_linear(x, w, b=None, *, tm_max=512):
    """y = x @ w (+ b) with x:(M,K), w:(K,N).  M is block-tiled and pipelined."""
    x = x.astype(jnp.float32)
    w = w.astype(jnp.float32)
    M, K = x.shape
    K2, Nout = w.shape
    assert K == K2
    if M <= tm_max:
        tm = _round_up(M, 8)
        m_pad = tm
    else:
        tm = tm_max
        m_pad = _round_up(M, tm)
    xp = x if m_pad == M else jnp.pad(x, ((0, m_pad - M), (0, 0)))
    grid = (m_pad // tm,)
    cp = pltpu.CompilerParams(dimension_semantics=("parallel",))
    if b is None:
        out = pl.pallas_call(
            _linear_nobias_kernel,
            grid=grid,
            in_specs=[
                pl.BlockSpec((tm, K), lambda i: (i, 0)),
                pl.BlockSpec((K, Nout), lambda i: (0, 0)),
            ],
            out_specs=pl.BlockSpec((tm, Nout), lambda i: (i, 0)),
            out_shape=jax.ShapeDtypeStruct((m_pad, Nout), jnp.float32),
            compiler_params=cp,
        )(xp, w)
    else:
        b2 = b.astype(jnp.float32).reshape(1, Nout)
        out = pl.pallas_call(
            _linear_bias_kernel,
            grid=grid,
            in_specs=[
                pl.BlockSpec((tm, K), lambda i: (i, 0)),
                pl.BlockSpec((K, Nout), lambda i: (0, 0)),
                pl.BlockSpec((1, Nout), lambda i: (0, 0)),
            ],
            out_specs=pl.BlockSpec((tm, Nout), lambda i: (i, 0)),
            out_shape=jax.ShapeDtypeStruct((m_pad, Nout), jnp.float32),
            compiler_params=cp,
        )(xp, w, b2)
    return out if m_pad == M else out[:M]


# ----------------------------------------------------------------------------
# Fused pretrans: msgs = x_i@Wxi + x_j@Wxj + e@We' + b  (edge encoder folded,
# no (E, 2C+F) concat materialized)
# ----------------------------------------------------------------------------
def _pretrans_kernel(xi_ref, xj_ref, e_ref, wi_ref, wj_ref, we_ref, b_ref, o_ref):
    acc = jnp.dot(xi_ref[...], wi_ref[...], preferred_element_type=jnp.float32)
    acc = acc + jnp.dot(xj_ref[...], wj_ref[...], preferred_element_type=jnp.float32)
    acc = acc + jnp.dot(e_ref[...], we_ref[...], preferred_element_type=jnp.float32)
    o_ref[...] = acc + b_ref[...]


def pallas_pretrans(x_i, x_j, e, wi, wj, we, b, *, tm_max=512):
    M, Ci = x_i.shape
    Ce = e.shape[1]
    D = wi.shape[1]
    if M <= tm_max:
        tm = _round_up(M, 8)
        m_pad = tm
    else:
        tm = tm_max
        m_pad = _round_up(M, tm)

    def padm(a):
        a = a.astype(jnp.float32)
        return a if m_pad == M else jnp.pad(a, ((0, m_pad - M), (0, 0)))

    out = pl.pallas_call(
        _pretrans_kernel,
        grid=(m_pad // tm,),
        in_specs=[
            pl.BlockSpec((tm, Ci), lambda i: (i, 0)),
            pl.BlockSpec((tm, Ci), lambda i: (i, 0)),
            pl.BlockSpec((tm, Ce), lambda i: (i, 0)),
            pl.BlockSpec((Ci, D), lambda i: (0, 0)),
            pl.BlockSpec((Ci, D), lambda i: (0, 0)),
            pl.BlockSpec((Ce, D), lambda i: (0, 0)),
            pl.BlockSpec((1, D), lambda i: (0, 0)),
        ],
        out_specs=pl.BlockSpec((tm, D), lambda i: (i, 0)),
        out_shape=jax.ShapeDtypeStruct((m_pad, D), jnp.float32),
        compiler_params=pltpu.CompilerParams(dimension_semantics=("parallel",)),
    )(padm(x_i), padm(x_j), padm(e),
      wi.astype(jnp.float32), wj.astype(jnp.float32), we.astype(jnp.float32),
      b.astype(jnp.float32).reshape(1, D))
    return out if m_pad == M else out[:M]


# ----------------------------------------------------------------------------
# Fused PNA aggregation (mean/max/min/std x identity/amp/att) + post-transform
# CSR-style: each N-block only visits its own dst-sorted E-blocks.
# ----------------------------------------------------------------------------
def _pna_agg_post_kernel(lo_ref, nb_ref, dstb_ref, msgs_ref, xt_ref, nsc_ref,
                         w_ref, b_ref, o_ref,
                         s_acc, ss_acc, mx_acc, mn_acc, feat_ref, *, tn, te):
    i = pl.program_id(0)
    k = pl.program_id(1)
    D = msgs_ref.shape[1]
    c_x = xt_ref.shape[1]

    @pl.when(k == 0)
    def _():
        s_acc[...] = jnp.zeros_like(s_acc)
        ss_acc[...] = jnp.zeros_like(ss_acc)
        mx_acc[...] = jnp.full_like(mx_acc, -jnp.inf)
        mn_acc[...] = jnp.full_like(mn_acc, jnp.inf)

    # Only accumulate over this node-block's own edge blocks.
    @pl.when(k < nb_ref[i])
    def _():
        dst = dstb_ref[...][0:1, :]                        # (1, TE) int32
        node_ids = i * tn + jax.lax.broadcasted_iota(jnp.int32, (tn, te), 0)
        mask = (node_ids == dst).astype(jnp.float32)       # (TN, TE) built in-kernel
        msgs = msgs_ref[...]                               # (TE, D)

        # Segment sums on the MXU (mask is the dense scatter matrix for this tile).
        s_acc[...] += jnp.dot(mask, msgs, preferred_element_type=jnp.float32)
        ss_acc[...] += jnp.dot(mask, msgs * msgs, preferred_element_type=jnp.float32)

        # Online max/min with the additive-mask trick, chunked over the edge
        # axis so the broadcast temp is (TN, 128, D) regardless of TE.
        gate = (mask - 1.0) * jnp.float32(1e30)            # 0 valid, -1e30 invalid
        mx = mx_acc[...]
        mn = mn_acc[...]
        for c in range(te // 128):
            m_c = msgs[c * 128:(c + 1) * 128, :]
            g_c = gate[:, c * 128:(c + 1) * 128]
            mx = jnp.maximum(mx, jnp.max(m_c[None, :, :] + g_c[:, :, None], axis=1))
            mn = jnp.minimum(mn, jnp.min(m_c[None, :, :] - g_c[:, :, None], axis=1))
        mx_acc[...] = mx
        mn_acc[...] = mn

    @pl.when(k == pl.num_programs(1) - 1)
    def _():
        nsc = nsc_ref[...]                                 # (TN, 4): deg, 1/deg, amp, att
        deg = nsc[:, 0:1]
        inv = nsc[:, 1:2]
        amp = nsc[:, 2:3]
        att = nsc[:, 3:4]
        has = deg > 0.0
        mean = s_acc[...] * inv
        var = ss_acc[...] * inv - mean * mean
        std = jnp.sqrt(jnp.maximum(var, 0.0) + 1e-5)
        mx = jnp.where(has, mx_acc[...], 0.0)              # empty segments -> 0
        mn = jnp.where(has, mn_acc[...], 0.0)

        # Assemble the 13 pieces (reference concat order) into one VMEM slab and
        # run a single K=(C+12D) MXU dot instead of 13 small dots.
        pieces = (mean, mx, mn, std,
                  mean * amp, mx * amp, mn * amp, std * amp,
                  mean * att, mx * att, mn * att, std * att)
        feat_ref[:, 0:c_x] = xt_ref[...]
        for idx, pc in enumerate(pieces):
            feat_ref[:, c_x + idx * D: c_x + (idx + 1) * D] = pc
        o_ref[...] = (jnp.dot(feat_ref[...], w_ref[...],
                              preferred_element_type=jnp.float32) + b_ref[...])


def pna_agg_posttrans(eblk_lo, eblk_nb, dstb, msgs, xt, nsc, w_post, b_post, *,
                      tn, te, kmax):
    n_pad, c_x = xt.shape
    e_pad, D = msgs.shape
    kd, out_ch = w_post.shape
    assert kd == c_x + 12 * D
    assert n_pad % tn == 0 and e_pad % te == 0
    max_eblk = e_pad // te - 1
    grid = (n_pad // tn, kmax)
    kernel = functools.partial(_pna_agg_post_kernel, tn=tn, te=te)

    def eblk_map(i, k, lo, nb):
        return (jnp.minimum(lo[i] + k, max_eblk), 0)

    grid_spec = pltpu.PrefetchScalarGridSpec(
        num_scalar_prefetch=2,
        grid=grid,
        in_specs=[
            pl.BlockSpec((8, te), eblk_map),                        # dst ids (x8 sublanes)
            pl.BlockSpec((te, D), eblk_map),                        # msgs
            pl.BlockSpec((tn, c_x), lambda i, k, lo, nb: (i, 0)),   # self features
            pl.BlockSpec((tn, 4), lambda i, k, lo, nb: (i, 0)),     # precomputed scalers
            pl.BlockSpec((kd, out_ch), lambda i, k, lo, nb: (0, 0)),  # fused post W
            pl.BlockSpec((1, out_ch), lambda i, k, lo, nb: (0, 0)),   # fused post b
        ],
        out_specs=pl.BlockSpec((tn, out_ch), lambda i, k, lo, nb: (i, 0)),
        scratch_shapes=[
            pltpu.VMEM((tn, D), jnp.float32),           # sum
            pltpu.VMEM((tn, D), jnp.float32),           # sum of squares
            pltpu.VMEM((tn, D), jnp.float32),           # running max
            pltpu.VMEM((tn, D), jnp.float32),           # running min
            pltpu.VMEM((tn, kd), jnp.float32),          # assembled feature slab
        ],
    )
    return pl.pallas_call(
        kernel,
        grid_spec=grid_spec,
        out_shape=jax.ShapeDtypeStruct((n_pad, out_ch), jnp.float32),
        compiler_params=pltpu.CompilerParams(
            dimension_semantics=("parallel", "arbitrary")),
    )(eblk_lo, eblk_nb, dstb, msgs.astype(jnp.float32), xt.astype(jnp.float32),
      nsc.astype(jnp.float32), w_post.astype(jnp.float32),
      b_post.astype(jnp.float32).reshape(1, out_ch))


def _choose_agg_tiles(N, E, D, vmem_budget=None):
    """Pick (TN, N_pad, TE).  The (TN,128,D) max/min temp must fit the budget."""
    if vmem_budget is None:
        vmem_budget = 4 * 1024 * 1024                    # safe on v7x (64 MiB VMEM)
        try:
            info = pltpu.get_tpu_info()
            if getattr(info, "vmem_capacity_bytes", 0) >= 96 * 1024 * 1024:
                vmem_budget = 8 * 1024 * 1024            # v5e / v6e: 128 MiB VMEM
        except Exception:
            pass
    tn_cap = 128
    while tn_cap > 8 and tn_cap * 128 * D * 4 > vmem_budget:
        tn_cap //= 2
    TN = min(_round_up(max(N, 1), 8), tn_cap)
    n_pad = _round_up(max(N, 1), TN)
    e_pad_min = _round_up(max(E, 1), 128)
    TE = min(256, e_pad_min)
    return TN, n_pad, TE


def _build_edge_blocks(src, dst, N, n_pad, tn, te):
    """Host-side structural preprocessing: dst-sort edges and build per-N-block
    edge-block pointers (CSR blocks) for the scalar-prefetched aggregation."""
    E = int(dst.shape[0])
    e_pad = _round_up(max(E, 1), te)
    perm = np.argsort(dst, kind="stable").astype(np.int32)
    dst_sp = np.full((e_pad,), n_pad, dtype=np.int32)    # pads never match a node
    dst_sp[:E] = dst[perm]
    src_sp = np.zeros((e_pad,), dtype=np.int32)
    src_sp[:E] = src[perm]
    num_nblk = n_pad // tn
    num_eblk = e_pad // te
    b_lo = np.searchsorted(dst_sp, np.arange(num_nblk) * tn, side="left")
    b_hi = np.searchsorted(dst_sp, (np.arange(num_nblk) + 1) * tn, side="left")
    lo = (b_lo // te).astype(np.int32)
    hi = ((b_hi + te - 1) // te).astype(np.int32)
    nb = np.where(b_hi > b_lo, hi - lo, 0).astype(np.int32)
    kmax = int(max(1, nb.max())) if num_nblk > 0 else 1
    dstb = np.ascontiguousarray(
        np.broadcast_to(dst_sp.reshape(num_eblk, 1, te), (num_eblk, 8, te))
    ).reshape(num_eblk * 8, te).astype(np.int32)
    return perm, src_sp, dst_sp, dstb, lo, nb, kmax, e_pad


# ----------------------------------------------------------------------------
# Fused-weight builders (done once at parameter-prep time)
# ----------------------------------------------------------------------------
def fuse_pretrans(pre_w, pre_b, ee_w, ee_b, in_ch, f_in, towers, divide_input):
    """Fold all towers' pretrans Linears AND the edge-encoder Linear into
    three weight blocks: Wxi, Wxj (in_ch, D) and We' (edge_dim, D), plus bias."""
    D = towers * f_in
    wxi = jnp.zeros((in_ch, D), jnp.float32)
    wxj = jnp.zeros((in_ch, D), jnp.float32)
    we = jnp.zeros((f_in, D), jnp.float32)
    for t in range(towers):
        wt = pre_w[t]                                   # (3*F_in, F_in)
        cols = slice(t * f_in, (t + 1) * f_in)
        if divide_input:
            rows = slice(t * f_in, (t + 1) * f_in)
            wxi = wxi.at[rows, cols].set(wt[0:f_in])
            wxj = wxj.at[rows, cols].set(wt[f_in:2 * f_in])
        else:                                           # f_in == in_ch
            wxi = wxi.at[:, cols].set(wt[0:f_in])
            wxj = wxj.at[:, cols].set(wt[f_in:2 * f_in])
        we = we.at[:, cols].set(wt[2 * f_in:3 * f_in])
    we_fold = ee_w.astype(jnp.float32) @ we             # (edge_dim, D)
    b = jnp.concatenate(pre_b) + ee_b.astype(jnp.float32) @ we
    return wxi, wxj, we_fold, b


def fuse_posttrans(post_w, post_b, in_ch, f_in, f_out, towers, divide_input):
    """One (in_ch + 12*D, towers*F_out) block-structured weight for all towers'
    posttrans; for divide_input=False the x-replication is folded in."""
    D = towers * f_in
    out_ch = towers * f_out
    wx = jnp.zeros((in_ch, out_ch), jnp.float32)
    wagg = jnp.zeros((12 * D, out_ch), jnp.float32)
    for t in range(towers):
        wt = post_w[t]                                  # (13*F_in, F_out)
        cols = slice(t * f_out, (t + 1) * f_out)
        if divide_input:
            wx = wx.at[t * f_in:(t + 1) * f_in, cols].set(wt[0:f_in])
        else:                                           # f_in == in_ch
            wx = wx.at[:, cols].set(wt[0:f_in])
        for p_ in range(12):
            wagg = wagg.at[p_ * D + t * f_in: p_ * D + (t + 1) * f_in, cols].set(
                wt[(p_ + 1) * f_in:(p_ + 2) * f_in])
    w = jnp.concatenate([wx, wagg], axis=0)             # (in_ch + 12*D, out_ch)
    b = jnp.concatenate(post_b)
    return w, b


# ----------------------------------------------------------------------------
# Plain-JAX glue (norms / pooling / gathers)
# ----------------------------------------------------------------------------
def batch_norm_eval(x, gamma, beta, r_mean, r_var, eps=1e-5):
    return (x - r_mean) / jnp.sqrt(r_var + eps) * gamma + beta


def graph_norm(x, batch, num_graphs, weight, bias, mean_scale, eps=1e-5):
    counts = jax.ops.segment_sum(jnp.ones((x.shape[0],), jnp.float32), batch, num_graphs)
    counts = jnp.maximum(counts, 1.0)[:, None]
    mean = jax.ops.segment_sum(x, batch, num_graphs) / counts
    out = x - mean[batch] * mean_scale
    var = jax.ops.segment_sum(out * out, batch, num_graphs) / counts
    std = jnp.sqrt(var + eps)
    return weight * out / std[batch] + bias


def global_mean_pool(x, batch, num_graphs):
    counts = jax.ops.segment_sum(jnp.ones((x.shape[0],), jnp.float32), batch, num_graphs)
    return jax.ops.segment_sum(x, batch, num_graphs) / jnp.maximum(counts, 1.0)[:, None]


# ----------------------------------------------------------------------------
# PNAConv layer
# ----------------------------------------------------------------------------
def pna_conv(p, x, gmeta, batch, num_graphs, *, residual, use_gn):
    N, C = x.shape
    xn = batch_norm_eval(x, p["bn_g"], p["bn_b"], p["bn_m"], p["bn_v"])
    if use_gn:
        xn = graph_norm(xn, batch, num_graphs, p["gn_w"], p["gn_b"], p["gn_ms"])
    x_res = xn

    # per-edge messages: endpoints gathered in dst-sorted order, edge-encoder
    # and all towers' pretrans fused into one 3-input kernel (no concat temp)
    x_i = jnp.take(xn, gmeta["dst_gather"], axis=0)                  # (E_pad, C)
    x_j = jnp.take(xn, gmeta["src_gather"], axis=0)                  # (E_pad, C)
    msgs = pallas_pretrans(x_i, x_j, gmeta["edge_feat"],
                           p["pre_wxi"], p["pre_wxj"], p["pre_we"], p["pre_b"])

    xt = jnp.pad(xn, ((0, gmeta["n_pad"] - N), (0, 0)))              # (N_pad, C)

    post = pna_agg_posttrans(gmeta["eblk_lo"], gmeta["eblk_nb"], gmeta["dstb"],
                             msgs, xt, gmeta["nsc"], p["post_w_f"], p["post_b_f"],
                             tn=gmeta["tn"], te=gmeta["te"], kmax=gmeta["kmax"])[:N]

    out = pallas_linear(post, p["lin_w"], p["lin_b"])
    if residual:
        out = out + x_res
    return out


# ----------------------------------------------------------------------------
# Full PNA model forward
# ----------------------------------------------------------------------------
def pna_forward(params, x, edge_index, edge_attr, batch, num_graphs, *, towers, avg_log):
    N = x.shape[0]
    E = edge_index.shape[1]
    hidden = params["vert_w"].shape[1]

    # ---- graph-structural preprocessing (host-side, layer-invariant) ----
    D_max = towers * hidden
    TN, n_pad, TE = _choose_agg_tiles(N, E, D_max)
    src_np = np.asarray(edge_index[0], dtype=np.int32)
    dst_np = np.asarray(edge_index[1], dtype=np.int32)
    perm, src_sp, dst_sp, dstb, lo, nb, kmax, e_pad = _build_edge_blocks(
        src_np, dst_np, N, n_pad, TN, TE)
    dst_gather = jnp.asarray(np.minimum(dst_sp, N - 1), dtype=jnp.int32)
    src_gather = jnp.asarray(np.minimum(src_sp, N - 1), dtype=jnp.int32)

    # degree-based scalers, precomputed once (graph-structural, layer-invariant)
    deg = jax.ops.segment_sum(jnp.ones((E,), jnp.float32),
                              jnp.asarray(dst_np), num_segments=N)
    deg_p = jnp.pad(deg, (0, n_pad - N))
    inv = 1.0 / jnp.maximum(deg_p, 1.0)
    logd = jnp.log(deg_p + 1.0)
    amp = logd * (1.0 / avg_log)
    att = jnp.where(deg_p > 0, avg_log / jnp.where(deg_p > 0, logd, 1.0), 1.0)
    nsc = jnp.stack([deg_p, inv, amp, att], axis=1)                  # (N_pad, 4)

    # ---- embeddings ----
    x = pallas_linear(x, params["vert_w"])                           # (N, hidden)
    e_emb = pallas_linear(edge_attr, params["edge_w"])               # (E, hidden)
    e_sorted = jnp.take(e_emb, jnp.asarray(perm), axis=0)
    e_sorted = jnp.pad(e_sorted, ((0, e_pad - E), (0, 0)))           # (E_pad, hidden)

    gmeta = dict(dst_gather=dst_gather, src_gather=src_gather, edge_feat=e_sorted,
                 dstb=jnp.asarray(dstb), eblk_lo=jnp.asarray(lo),
                 eblk_nb=jnp.asarray(nb), nsc=nsc,
                 tn=TN, te=TE, kmax=kmax, n_pad=n_pad)

    for i, lp in enumerate(params["main"]):
        x = pna_conv(lp, x, gmeta, batch, num_graphs, residual=True, use_gn=(i > 0))

    x = pna_conv(params["main_o"], x, gmeta, batch, num_graphs,
                 residual=True, use_gn=True)

    x = global_mean_pool(x, batch, num_graphs)                       # (num_graphs, hidden)

    h = pallas_linear(x, params["head_w1"], params["head_b1"])
    h = jax.nn.gelu(h, approximate=False)                            # exact GELU
    # nn.Dropout(p=0.5) is identity in eval mode
    y = pallas_linear(h, params["head_w2"], params["head_b2"])
    return y


# ----------------------------------------------------------------------------
# Deterministic parameter init (shapes from the PyTorch module __init__)
# ----------------------------------------------------------------------------
def init_linear(key, fan_in, fan_out, bias=True):
    kw, kb = jax.random.split(key)
    bound = 1.0 / math.sqrt(fan_in)
    w = jax.random.uniform(kw, (fan_in, fan_out), jnp.float32, -bound, bound)
    b = jax.random.uniform(kb, (fan_out,), jnp.float32, -bound, bound) if bias else None
    return w, b


def init_pna_conv(key, in_ch, out_ch, edge_dim, towers, divide_input, use_gn):
    F_in = in_ch // towers if divide_input else in_ch
    F_out = out_ch // towers
    ks = jax.random.split(key, 2 * towers + 2)
    p = {
        "bn_g": jnp.ones((in_ch,), jnp.float32),
        "bn_b": jnp.zeros((in_ch,), jnp.float32),
        "bn_m": jnp.zeros((in_ch,), jnp.float32),
        "bn_v": jnp.ones((in_ch,), jnp.float32),
    }
    if use_gn:
        p["gn_w"] = jnp.ones((in_ch,), jnp.float32)
        p["gn_b"] = jnp.zeros((in_ch,), jnp.float32)
        p["gn_ms"] = jnp.ones((in_ch,), jnp.float32)
    ee_w, ee_b = init_linear(ks[0], edge_dim, F_in)
    pre_w, pre_b, post_w, post_b = [], [], [], []
    for t in range(towers):
        w, b = init_linear(ks[1 + t], 3 * F_in, F_in)                     # pretrans
        pre_w.append(w)
        pre_b.append(b)
        w, b = init_linear(ks[1 + towers + t], (4 * 3 + 1) * F_in, F_out)  # posttrans
        post_w.append(w)
        post_b.append(b)
    (p["pre_wxi"], p["pre_wxj"], p["pre_we"], p["pre_b"]) = fuse_pretrans(
        pre_w, pre_b, ee_w, ee_b, in_ch, F_in, towers, divide_input)
    p["post_w_f"], p["post_b_f"] = fuse_posttrans(
        post_w, post_b, in_ch, F_in, F_out, towers, divide_input)
    p["lin_w"], p["lin_b"] = init_linear(ks[1 + 2 * towers], out_ch, out_ch)
    return p


# ----------------------------------------------------------------------------
if __name__ == "__main__":
    key = jax.random.PRNGKey(0)

    hidden = 32
    towers = 4
    n_layers = 2          # small but structurally identical to the 5-layer default
    n_ff = 64
    n_ydim = 1
    num_graphs = 2
    nodes_per_graph = 6
    N = num_graphs * nodes_per_graph

    # avg_deg['log'] from the PNA.__init__ degree histogram
    deg_counts = [108477, 299931, 180702, 10767, 3, 2]   # degrees 1..6
    total = sum(deg_counts)
    avg_log = sum(math.log(i + 2) * c for i, c in enumerate(deg_counts)) / total
    # avg_lin / avg_exp exist in the module but are unused by the chosen scalers.

    # Build a small 2-graph batch: per-graph bidirectional ring + chord edges
    src_list, dst_list = [], []
    for g in range(num_graphs):
        base = g * nodes_per_graph
        for i in range(nodes_per_graph):
            j = (i + 1) % nodes_per_graph
            src_list += [base + i, base + j]
            dst_list += [base + j, base + i]
        for i in range(nodes_per_graph):
            src_list.append(base + i)
            dst_list.append(base + (i + 2) % nodes_per_graph)
    edge_index = jnp.array([src_list, dst_list], dtype=jnp.int32)   # (2, E)
    E = edge_index.shape[1]
    batch = jnp.repeat(jnp.arange(num_graphs, dtype=jnp.int32), nodes_per_graph)

    k_in, k_params = jax.random.split(key)
    kx, ke = jax.random.split(k_in)
    x = jax.random.normal(kx, (N, 13), jnp.float32)          # node features (13-dim)
    edge_attr = jax.random.normal(ke, (E, 4), jnp.float32)   # edge features (4-dim)

    ks = jax.random.split(k_params, n_layers + 5)
    params = {}
    params["vert_w"], _ = init_linear(ks[0], 13, hidden, bias=False)
    params["edge_w"], _ = init_linear(ks[1], 4, hidden, bias=False)
    params["main"] = [
        init_pna_conv(ks[2 + i], hidden, hidden, hidden, towers,
                      divide_input=False, use_gn=(i > 0))
        for i in range(n_layers)
    ]
    params["main_o"] = init_pna_conv(ks[2 + n_layers], hidden, hidden, hidden, towers,
                                     divide_input=True, use_gn=True)
    params["head_w1"], params["head_b1"] = init_linear(ks[3 + n_layers], hidden, n_ff)
    params["head_w2"], params["head_b2"] = init_linear(ks[4 + n_layers], n_ff, n_ydim)

    y = pna_forward(params, x, edge_index, edge_attr, batch, num_graphs,
                    towers=towers, avg_log=avg_log)
    y = jax.block_until_ready(y)
    assert y.shape == (num_graphs, n_ydim)
    assert bool(jnp.all(jnp.isfinite(y)))
    print("KERNEL_OK")
</pallas_src>

<mosaic_0001>
module attributes {stable_mosaic.version = 11 : i64} {
  func.func @_linear_nobias_kernel(%arg0: i32, %arg1: memref<16x13xf32, #tpu.memory_space<vmem>>, %arg2: memref<13x32xf32, #tpu.memory_space<vmem>>, %arg3: memref<16x32xf32, #tpu.memory_space<vmem>>) attributes {dimension_semantics = [#tpu.dimension_semantics<parallel>], iteration_bounds = array<i64: 1>, scalar_prefetch = 0 : i64, scratch_operands = 0 : i64, tpu.core_type = #tpu.core_type<tc>, window_params = [{transform_indices = @transform_0, window_bounds = array<i64: 16, 13>}, {pipeline_mode = #tpu.pipeline_mode<synchronous>, transform_indices = @transform_1, window_bounds = array<i64: 13, 32>}, {transform_indices = @transform_2, window_bounds = array<i64: 16, 32>}]} {
    %c0 = arith.constant 0 : index
    %c0_0 = arith.constant 0 : index
    %0 = vector.load %arg1[%c0, %c0_0] : memref<16x13xf32, #tpu.memory_space<vmem>>, vector<16x13xf32>
    %c0_1 = arith.constant 0 : index
    %c0_2 = arith.constant 0 : index
    %1 = vector.load %arg2[%c0_1, %c0_2] : memref<13x32xf32, #tpu.memory_space<vmem>>, vector<13x32xf32>
    %cst = arith.constant dense<0.000000e+00> : vector<16x32xf32>
    %2 = tpu.matmul %0, %1, %cst {dimension_numbers = #tpu.dot_dimension_numbers<[1], [0], [0], [1], [0, 0, 1, 1], [], []>} : vector<16x13xf32>, vector<13x32xf32>, vector<16x32xf32> -> vector<16x32xf32>
    %c0_3 = arith.constant 0 : index
    %c0_4 = arith.constant 0 : index
    %3 = vector.load %arg3[%c0_3, %c0_4] : memref<16x32xf32, #tpu.memory_space<vmem>>, vector<16x32xf32>
    tpu.vector_store %arg3[%c0_3, %c0_4], %2 {strides = array<i32>} : memref<16x32xf32, #tpu.memory_space<vmem>>, vector<16x32xf32>,
    return
  }
  func.func @transform_0(%arg0: i32) -> (i32, i32) {
    %c0_i32 = arith.constant 0 : i32
    %c0_i32_0 = arith.constant 0 : i32
    return %arg0, %c0_i32 : i32, i32
  }
  func.func @transform_1(%arg0: i32) -> (i32, i32) {
    %c0_i32 = arith.constant 0 : i32
    %c0_i32_0 = arith.constant 0 : i32
    %c0_i32_1 = arith.constant 0 : i32
    return %c0_i32, %c0_i32_0 : i32, i32
  }
  func.func @transform_2(%arg0: i32) -> (i32, i32) {
    %c0_i32 = arith.constant 0 : i32
    %c0_i32_0 = arith.constant 0 : i32
    return %arg0, %c0_i32 : i32, i32
  }
}

</mosaic_0001>

<bundles_post_ra>
// kernel: tpu_custom_call.1
= control target key start
LH: loop header
LB: loop body
LE: loop exit
PB: predicated region body
PF: predicated region fallthrough
CT: control target
= control target key end

     0   :  { %7 = vsyncpa [#allocation3], 0  ;;  %s274_s0 = inlined_call_operand.hbm [shape: f32[16,13], index: 0, kind: input, shape index: {}]   ;;  %s275_s1 = inlined_call_operand.hbm [shape: f32[13,32], index: 1, kind: input, shape index: {}]   ;;  %s276_s2 = inlined_call_operand.hbm [shape: f32[16,32], index: 2, kind: output, shape index: {}]  }
   0x1   :  { %8 = vsyncpa [#allocation6], 0 }
   0x2   :  { %9 = vsyncpa [#allocation4], 0  ;;  %s236_s9 = smov [#allocation2]  }
   0x3   :  { %s15_s10 = sshll.u32 %s236_s9, 4  ;;  %s16_s10 = int_to_ptr.vmem [resolvable:$true] %s15_s10 }
   0x4   :  { %s178_s11 = scalar_lea.vmem %s16_s10, 256  ;;  %p183_p1 = scmp.lt.s32.totalorder %s16_s10, %s16_s10 }
   0x5   :  { %p179_p0 = scmp.ne.s32.totalorder %s16_s10, %s178_s11  ;;  %p184_p2 = scmp.lt.s32.totalorder %s178_s11, %s178_s11 }
   0x7   :  { %p185_p3 = por %p184_p2, %p183_p1 }
   0x9   :  { %p186_p4 = pnand %p185_p3, %p179_p0 }
   0xb   :  { %189 = shalt.err (!%p186_p4)
}
   0xc   :  { %s237_s12 = smov 128   ;;  %s238_s13 = smov 8  }
   0xd   :  { %21 = dma.hbm_to_vmem [thread:$0]  %s274_s0, 256, %s16_s10, [#allocation3], %s237_s12, %s237_s12, %s238_s13  }
   0xe   :  { %s239_s16 = smov [#allocation5]  }
   0xf   :  { %s27_s17 = sshll.u32 %s239_s16, 4  ;;  %s28_s17 = int_to_ptr.vmem [resolvable:$true] %s27_s17 }
  0x10   :  { %s198_s18 = scalar_lea.vmem %s28_s17, 256  ;;  %p203_p6 = scmp.lt.s32.totalorder %s28_s17, %s28_s17 }
  0x11   :  { %p199_p5 = scmp.ne.s32.totalorder %s28_s17, %s198_s18  ;;  %p204_p7 = scmp.lt.s32.totalorder %s198_s18, %s198_s18 }
  0x13   :  { %p205_p8 = por %p204_p7, %p203_p6 }
  0x15   :  { %p206_p9 = pnand %p205_p8, %p199_p5 }
  0x17   :  { %209 = shalt.err (!%p206_p9)
}
  0x18   :  { %33 = dma.hbm_to_vmem [thread:$0]  %s275_s1, 256, %s28_s17, [#allocation6], %s237_s12, %s237_s12, %s238_s13  }
  0x19   :  { %230 = dma.done.wait [#allocation3], 256  }
  0x1a   :  { %231 = vsyncadd [#allocation3], 4294967040 }
  0x1b   :  { %232 = dma.done.wait [#allocation6], 256  }
  0x1c   :  { %233 = vsyncadd [#allocation6], 4294967040  ;;  %vm51_vm0 = vcmask 1044480   ;;  %vm44_vm1 = vcmask 105472   ;;  %v43_v0 = vld [vmem:[#allocation5 + $0x8] sm:$0x1f] }
  0x1d   :  { %v42_v1 = vld [vmem:[#allocation5] sm:$0xff]  ;;  %v40_v2 = vld [vmem:[#allocation2] sm:$0xff]  ;;  %158 = vmatprep.subr.msk.mxu0 %vm51_vm0, %v43_v0  ;;  %v41_v3 = vld [vmem:[#allocation2 + $0x8] sm:$0xff]  ;;  %vm130_vm2 = vcmask 261120   ;;  %s240_s0 = smov [#allocation7]  }
  0x1e   :  { %162 = vmatprep.mubr.msk.f32.mxu0 %vm44_vm1, %v40_v2  ;;  %159 = vmatpush3.msk.msra.mxu0 %vm51_vm0, %v43_v0  ;;  %s138_s21 = sshll.u32 %s240_s0, 4  ;;  %s139_s21 = int_to_ptr.vmem [resolvable:$true] %s138_s21 }
  0x1f   :  { %160 = vmatprep.subr.mxu0 %v42_v1  ;;  %s210_s1 = scalar_lea.vmem %s139_s21, 256  ;;  %p215_p11 = scmp.lt.s32.totalorder %s139_s21, %s139_s21 }
  0x20   :  { %161 = vmatpush3.msra.mxu0 %v42_v1  ;;  %p211_p10 = scmp.ne.s32.totalorder %s139_s21, %s210_s1  ;;  %p216_p12 = scmp.lt.s32.totalorder %s210_s1, %s210_s1 }
  0x21   :  { %163 = vmatmul.mubr.msk.f32.vlgmr.msra.gmra.mxu0 %vm44_vm1, %v41_v3 }
  0x22   :  { %p217_p13 = por %p216_p12, %p215_p11 }
  0x24   :  { %p218_p0 = pnand %p217_p13, %p211_p10 }
  0xe1   :  { %v164_v4 = vpop.f32.mrf.mxu0 }
  0xe2   :  { %132 = vst.msk [vmem:[#allocation7 + $0x8] sm:$0xff] %vm130_vm2, %v164_v4 }
  0xe3   :  { %v121_v5 = vpop.f32.mrf.mxu0 }
  0xe4   :  { %131 = vst.msk [vmem:[#allocation7] sm:$0xff] %vm130_vm2, %v121_v5 }
  0xe5   :  { %221 = shalt.err (!%p218_p0)
}
  0xe6   :  { %144 = dma.vmem_to_hbm [thread:$0]  %s139_s21, 256, %s276_s2, [#allocation4], %s237_s12, %s237_s12, %s238_s13  }
  0xe7   :  { %234 = dma.done.wait [#allocation4], 256  }
  0xe8   :  { %235 = vsyncadd [#allocation4], 4294967040 }
  0xe9   :  { %148 = vsyncpa [#allocation3], 1 }
  0xea   :  { %149 = vsyncpa [#allocation6], 1 }
  0xeb   :  { %150 = vsyncpa [#allocation4], 1 }

</bundles_post_ra>
